<compile_context>
chip_gen: v7x
topology: tpu7x:2x2x1
jax: 0.10.0
libtpu: 0.0.40
codegen_flags: <defaults>
</compile_context>

<pallas_src>
import math

import jax
import jax.numpy as jnp
import numpy as np
from jax import lax
from jax.experimental import pallas as pl
from jax.experimental.pallas import tpu as pltpu

# ---- forward-consistent (small) dims ----
B = 2              # batch
S = 8              # seq_len
IN_DIM = 1         # input_dim
HD = 32            # hidden_dim (attention head dim == ssm hidden dim, as in the module)
NH = 4             # num_heads
OUT_DIM = 1        # output_dim
M = 4              # num_ssm_modules
NHD = NH * HD      # 128  (q/k/v projection width)
MHD = M * HD       # 128  (packed SSM width)
BS = B * S         # 16   (batch*seq rows, stacked along sublanes)
NHBS = NH * BS     # 64   (heads packed along sublanes)
# num_ssm_layers = 3 -> obs MLP: Lin(1,HD) GELU, Lin(HD,HD) GELU, Lin(HD,HD) GELU, Lin(HD,1)

# ---- hoisted param-pack layout: one (PACK_ROWS, 128) f32 buffer ----
OFF_W2 = 0                      # (128,128) block-diag W2
OFF_W3 = OFF_W2 + MHD           # (128,128) block-diag W3
OFF_WT = OFF_W3 + MHD           # (128,128) block-diag transition W
OFF_HMASK = OFF_WT + MHD        # (64,128)  0/1 head mask for packed Q
OFF_WFC = OFF_HMASK + NHBS      # (64,128)  per-head-masked fc weights (value fold)
OFF_ABIAS = OFF_WFC + NHBS      # (64,128)  additive same-batch mask (lanes 0:16 used)
OFF_ROWS = OFF_ABIAS + NHBS     # (1,128) parameter rows start here (576)
R_WQ, R_BQ, R_WK, R_BK, R_WV, R_BV = 0, 1, 2, 3, 4, 5
R_W1, R_B1, R_B2, R_B3, R_WOUT, R_BT, R_MISC = 6, 7, 8, 9, 10, 11, 12
N_ROWS = 13
PACK_ROWS = OFF_ROWS + 16       # 592 (rows block padded to 16 -> total mult. of 8)


def _erf(x):
    # Abramowitz & Stegun 7.1.26 rational approximation (|err| < 1.5e-7).
    # Matches torch.nn.GELU()'s exact (erf-based) definition to f32 precision
    # using only ops guaranteed to lower in Mosaic (exp / mul / add / where).
    p = 0.3275911
    a1, a2, a3, a4, a5 = 0.254829592, -0.284496736, 1.421413741, -1.453152027, 1.061405429
    z = jnp.abs(x)
    t = 1.0 / (1.0 + p * z)
    poly = ((((a5 * t + a4) * t + a3) * t + a2) * t + a1) * t
    y = 1.0 - poly * jnp.exp(-z * z)
    return jnp.where(x >= 0, y, -y)


def _gelu(x):
    return 0.5 * x * (1.0 + _erf(x * 0.7071067811865476))


def ozone_kernel(x_ref, st_ref, pk_ref, out_ref):
    def prow(i):                                   # (1,128) static ref-slice load
        j = OFF_ROWS + i
        return pk_ref[j:j + 1, :]

    # ---- q/k/v affines: broadcast x once, reuse ----
    xb = jnp.broadcast_to(x_ref[...], (BS, NHD))   # (16,128)
    q = xb * prow(R_WQ) + prow(R_BQ)               # softmax scale pre-folded into rows
    k = xb * prow(R_WK) + prow(R_BK)
    v = xb * prow(R_WV) + prow(R_BV)

    # ---- packed-head attention: heads stacked along sublanes ----
    # qp[h*16+i, lane] = q[i, lane] * [lane belongs to head h]
    qp = jnp.concatenate([q] * NH, axis=0) * pk_ref[OFF_HMASK:OFF_HMASK + NHBS, :]  # (64,128)
    e = lax.dot_general(qp, k, (((1,), (1,)), ((), ())),
                        preferred_element_type=jnp.float32)                         # (64,16)
    # additive mask: 0 within the same batch element, -1e30 across batch elements
    e = e + pk_ref[OFF_ABIAS:OFF_ABIAS + NHBS, 0:BS]
    e = e - jnp.max(e, axis=-1, keepdims=True)     # kept for numerical safety
    p = jnp.exp(e)                                 # masked lanes underflow to exactly 0
    denom = jnp.sum(p, axis=-1, keepdims=True)     # (64,1)

    # fc (Linear(128,1)) folded into V: rexp[h*16+i, j] = sum_d v[j, h*HD+d]*wfc[h*HD+d]
    rexp = lax.dot_general(pk_ref[OFF_WFC:OFF_WFC + NHBS, :], v, (((1,), (1,)), ((), ())),
                           preferred_element_type=jnp.float32)                      # (64,16)
    num = jnp.sum(p * rexp, axis=-1, keepdims=True)                                 # (64,1)
    c = num / denom                                                                 # (64,1)
    # head sum via vreg-aligned sublane slices (fc bias folded into b1 row)
    attended = c[0:BS] + c[BS:2 * BS] + c[2 * BS:3 * BS] + c[3 * BS:4 * BS]         # (16,1)

    # ---- SSM observation MLPs: 4 modules packed along the 128 lanes ----
    h1 = _gelu(attended * prow(R_W1) + prow(R_B1))                                  # (16,128)
    h2 = _gelu(jnp.dot(h1, pk_ref[OFF_W2:OFF_W2 + MHD, :],
                       preferred_element_type=jnp.float32) + prow(R_B2))
    h3 = _gelu(jnp.dot(h2, pk_ref[OFF_W3:OFF_W3 + MHD, :],
                       preferred_element_type=jnp.float32) + prow(R_B3))
    # observation = mean over modules (wout pre-scaled by 1/M, mean(bout) in misc row)
    obs = lax.dot_general(prow(R_WOUT), h3, (((1,), (1,)), ((), ())),
                          preferred_element_type=jnp.float32)                       # (1,16)

    # ---- State transitions: one (B,128) @ (128,128) block-diagonal matmul ----
    ns = jnp.dot(st_ref[...], pk_ref[OFF_WT:OFF_WT + MHD, :],
                 preferred_element_type=jnp.float32) + prow(R_BT)                   # (2,128)

    # ---- single merged lane-dense output ----
    out_ref[0:B, :] = ns
    out_ref[B:B + 1, 0:BS] = obs + pk_ref[OFF_ROWS + R_MISC:OFF_ROWS + R_MISC + 1, 0:BS]


def pack_params(params):
    """Hoisted: build the single (PACK_ROWS,128) param pack ONCE per parameter set."""
    (wq, bq, wk, bk, wv, bv, wfc_t, bfc,
     w1, b1, w2, b2, w3, b3, wout_t, bout, wt, bt) = params
    inv_scale = 1.0 / math.sqrt(HD)

    def block_diag(wm):                            # (M,HD,HD) -> (128,128)
        eye = jnp.eye(M, dtype=wm.dtype)
        return jnp.einsum('mij,mn->minj', wm, eye).reshape(MHD, MHD)

    # static masks (pure numpy)
    row_head = np.repeat(np.arange(NH), BS)                          # (64,)
    lane_head = np.arange(NHD) // HD                                 # (128,)
    headmask = (row_head[:, None] == lane_head[None, :]).astype(np.float32)   # (64,128)

    qb = (np.arange(NHBS) % BS) // S                                 # query batch per row
    kb = np.arange(BS) // S                                          # key batch per lane
    abias = np.zeros((NHBS, NHD), np.float32)
    abias[:, :BS] = np.where(qb[:, None] == kb[None, :], 0.0, -1e30).astype(np.float32)

    hm = jnp.asarray(headmask)
    wfc64 = hm * wfc_t.reshape(1, NHD)                               # (64,128)

    w1r = w1.reshape(1, MHD)
    rows = jnp.concatenate([
        wq.reshape(1, NHD) * inv_scale, bq.reshape(1, NHD) * inv_scale,   # scale folded
        wk.reshape(1, NHD), bk.reshape(1, NHD),
        wv.reshape(1, NHD), bv.reshape(1, NHD),
        w1r,
        b1.reshape(1, MHD) + bfc.reshape(1, 1) * w1r,                # fc bias folded
        b2.reshape(1, MHD), b3.reshape(1, MHD),
        wout_t.reshape(1, MHD) * (1.0 / M),                          # mean over modules
        bt.reshape(1, MHD),
        jnp.full((1, MHD), jnp.mean(bout), jnp.float32),             # misc: mean(bout)
        jnp.zeros((PACK_ROWS - OFF_ROWS - N_ROWS, MHD), jnp.float32),
    ], axis=0)

    pack = jnp.concatenate([
        block_diag(w2), block_diag(w3), block_diag(wt),
        hm, wfc64, jnp.asarray(abias),
        rows,
    ], axis=0).astype(jnp.float32)
    assert pack.shape == (PACK_ROWS, MHD)
    return pack


def ozone_forward(x, states_tuple, pack):
    """Per-call path: no weight math, 3 input DMAs, 1 merged output DMA."""
    x_flat = x.reshape(BS, IN_DIM)
    states_flat = jnp.stack(states_tuple, axis=1).reshape(B, MHD)    # (B,128), lanes m*HD+d

    out = pl.pallas_call(
        ozone_kernel,
        out_shape=jax.ShapeDtypeStruct((4, MHD), jnp.float32),
        compiler_params=pltpu.CompilerParams(vmem_limit_bytes=16 * 1024 * 1024),
    )(x_flat, states_flat, pack)

    obs = out[B, 0:BS].reshape(B, S, OUT_DIM)
    new_states = out[0:B, :].reshape(B, M, HD)
    return (obs,) + tuple(new_states[:, m, :] for m in range(M))


def ref_forward(x, states_tuple, params):
    """Pure-JAX reference mirroring the PyTorch forward (full-f32 matmuls)."""
    (wq, bq, wk, bk, wv, bv, wfc_t, bfc,
     w1, b1, w2, b2, w3, b3, wout_t, bout, wt, bt) = params
    hp = jax.lax.Precision.HIGHEST
    gelu = lambda z: jax.nn.gelu(z, approximate=False)               # torch nn.GELU() (exact)
    mm = lambda a, b: jnp.matmul(a, b, precision=hp)

    q = (mm(x, wq) + bq).reshape(B, S, NH, HD)
    k = (mm(x, wk) + bk).reshape(B, S, NH, HD)
    v = (mm(x, wv) + bv).reshape(B, S, NH, HD)
    energy = jnp.einsum('bqhd,bkhd->bhqk', q, k, precision=hp)
    attn = jax.nn.softmax(energy / (HD ** 0.5), axis=-1)
    out = jnp.einsum('bhqk,bkhd->bqhd', attn, v, precision=hp).reshape(B, S, NH * HD)
    attended = mm(out, wfc_t.T) + bfc                                # (B,S,1)

    obs_list, ns_list = [], []
    for m in range(M):
        h = gelu(mm(attended, w1[m]) + b1[m])
        h = gelu(mm(h, w2[m]) + b2[m])
        h = gelu(mm(h, w3[m]) + b3[m])
        obs_list.append(mm(h, wout_t[m].T) + bout[m])
        ns_list.append(mm(states_tuple[m], wt[m]) + bt[m].reshape(1, HD))
    observation = jnp.mean(jnp.stack(obs_list), axis=0)
    return (observation,) + tuple(ns_list)


def init_params(key):
    ks = iter(jax.random.split(key, 40))

    def u(shape, fan_in):
        bound = 1.0 / np.sqrt(fan_in)
        return jax.random.uniform(next(ks), shape, jnp.float32, -bound, bound)

    wq = u((IN_DIM, NHD), IN_DIM); bq = u((1, NHD), IN_DIM)
    wk = u((IN_DIM, NHD), IN_DIM); bk = u((1, NHD), IN_DIM)
    wv = u((IN_DIM, NHD), IN_DIM); bv = u((1, NHD), IN_DIM)
    wfc_t = u((1, NHD), NHD); bfc = u((1, 1), NHD)
    w1 = u((M, IN_DIM, HD), IN_DIM); b1 = u((M, 1, HD), IN_DIM)
    w2 = u((M, HD, HD), HD); b2 = u((M, 1, HD), HD)
    w3 = u((M, HD, HD), HD); b3 = u((M, 1, HD), HD)
    wout_t = u((M, 1, HD), HD); bout = u((M, 1, 1), HD)
    wt = u((M, HD, HD), HD); bt = u((M, 1, HD), HD)
    return (wq, bq, wk, bk, wv, bv, wfc_t, bfc,
            w1, b1, w2, b2, w3, b3, wout_t, bout, wt, bt)


if __name__ == "__main__":
    key = jax.random.PRNGKey(0)
    kx, kst, kp = jax.random.split(key, 3)

    x = jax.random.normal(kx, (B, S, IN_DIM), jnp.float32)
    state_keys = jax.random.split(kst, M)
    states = tuple(jax.random.normal(state_keys[m], (B, HD), jnp.float32) for m in range(M))
    params = init_params(kp)

    # Hoisted packing: done once per parameter set, not per forward call.
    pack = jax.block_until_ready(pack_params(params))

    fwd = jax.jit(ozone_forward)
    outs = jax.block_until_ready(fwd(x, states, pack))
    refs = jax.block_until_ready(ref_forward(x, states, params))

    for o, r in zip(outs, refs):
        assert o.shape == r.shape, (o.shape, r.shape)
        # Tolerance sized to absorb possible reduced-precision (bf16-pass) MXU
        # handling of f32 dots; structural/wiring errors would be O(0.1..1).
        assert np.allclose(np.asarray(o), np.asarray(r), rtol=1e-2, atol=5e-3), \
            float(np.max(np.abs(np.asarray(o) - np.asarray(r))))

    print("KERNEL_OK")
</pallas_src>

<mosaic_0001>
module attributes {stable_mosaic.version = 11 : i64} {
  func.func @ozone_kernel(%arg0: memref<16x1xf32, #tpu.memory_space<vmem>>, %arg1: memref<2x128xf32, #tpu.memory_space<vmem>>, %arg2: memref<592x128xf32, #tpu.memory_space<vmem>>, %arg3: memref<4x128xf32, #tpu.memory_space<vmem>>) attributes {dimension_semantics = [], scalar_prefetch = 0 : i64, scratch_operands = 0 : i64, tpu.core_type = #tpu.core_type<tc>} {
    %c0 = arith.constant 0 : index
    %c0_0 = arith.constant 0 : index
    %0 = vector.load %arg0[%c0, %c0_0] : memref<16x1xf32, #tpu.memory_space<vmem>>, vector<16x1xf32>
    %1 = vector.shape_cast %0 : vector<16x1xf32> to vector<16x1xf32>
    %2 = vector.broadcast %1 : vector<16x1xf32> to vector<16x128xf32>
    %c576 = arith.constant 576 : index
    %c0_1 = arith.constant 0 : index
    %3 = vector.load %arg2[%c576, %c0_1] : memref<592x128xf32, #tpu.memory_space<vmem>>, vector<1x128xf32>
    %4 = vector.broadcast %3 : vector<1x128xf32> to vector<16x128xf32>
    %5 = arith.mulf %2, %4 : vector<16x128xf32>
    %c577 = arith.constant 577 : index
    %c0_2 = arith.constant 0 : index
    %6 = vector.load %arg2[%c577, %c0_2] : memref<592x128xf32, #tpu.memory_space<vmem>>, vector<1x128xf32>
    %7 = vector.broadcast %6 : vector<1x128xf32> to vector<16x128xf32>
    %8 = arith.addf %5, %7 : vector<16x128xf32>
    %c578 = arith.constant 578 : index
    %c0_3 = arith.constant 0 : index
    %9 = vector.load %arg2[%c578, %c0_3] : memref<592x128xf32, #tpu.memory_space<vmem>>, vector<1x128xf32>
    %10 = vector.broadcast %9 : vector<1x128xf32> to vector<16x128xf32>
    %11 = arith.mulf %2, %10 : vector<16x128xf32>
    %c579 = arith.constant 579 : index
    %c0_4 = arith.constant 0 : index
    %12 = vector.load %arg2[%c579, %c0_4] : memref<592x128xf32, #tpu.memory_space<vmem>>, vector<1x128xf32>
    %13 = vector.broadcast %12 : vector<1x128xf32> to vector<16x128xf32>
    %14 = arith.addf %11, %13 : vector<16x128xf32>
    %c580 = arith.constant 580 : index
    %c0_5 = arith.constant 0 : index
    %15 = vector.load %arg2[%c580, %c0_5] : memref<592x128xf32, #tpu.memory_space<vmem>>, vector<1x128xf32>
    %16 = vector.broadcast %15 : vector<1x128xf32> to vector<16x128xf32>
    %17 = arith.mulf %2, %16 : vector<16x128xf32>
    %c581 = arith.constant 581 : index
    %c0_6 = arith.constant 0 : index
    %18 = vector.load %arg2[%c581, %c0_6] : memref<592x128xf32, #tpu.memory_space<vmem>>, vector<1x128xf32>
    %19 = vector.broadcast %18 : vector<1x128xf32> to vector<16x128xf32>
    %20 = arith.addf %17, %19 : vector<16x128xf32>
    %21 = tpu.concatenate %8, %8, %8, %8 in 0 : vector<16x128xf32>, vector<16x128xf32>, vector<16x128xf32>, vector<16x128xf32> -> vector<64x128xf32>
    %c384 = arith.constant 384 : index
    %c0_7 = arith.constant 0 : index
    %22 = vector.load %arg2[%c384, %c0_7] : memref<592x128xf32, #tpu.memory_space<vmem>>, vector<64x128xf32>
    %23 = arith.mulf %21, %22 : vector<64x128xf32>
    %cst = arith.constant dense<0.000000e+00> : vector<64x16xf32>
    %24 = tpu.matmul %23, %14, %cst {dimension_numbers = #tpu.dot_dimension_numbers<[1], [1], [0], [0], [0, 0, 1, 0], [], []>} : vector<64x128xf32>, vector<16x128xf32>, vector<64x16xf32> -> vector<64x16xf32>
    %c512 = arith.constant 512 : index
    %c0_8 = arith.constant 0 : index
    %25 = vector.load %arg2[%c512, %c0_8] : memref<592x128xf32, #tpu.memory_space<vmem>>, vector<64x16xf32>
    %26 = arith.addf %24, %25 : vector<64x16xf32>
    %cst_9 = arith.constant dense<0xFF800000> : vector<64xf32>
    %27 = vector.multi_reduction <maximumf>, %26, %cst_9 [1] : vector<64x16xf32> to vector<64xf32>
    %28 = vector.shape_cast %27 : vector<64xf32> to vector<64x1xf32>
    %29 = vector.broadcast %28 : vector<64x1xf32> to vector<64x16xf32>
    %30 = arith.subf %26, %29 : vector<64x16xf32>
    %31 = math.exp %30 : vector<64x16xf32>
    %cst_10 = arith.constant dense<0.000000e+00> : vector<64xf32>
    %32 = vector.multi_reduction <add>, %31, %cst_10 [1] : vector<64x16xf32> to vector<64xf32>
    %33 = vector.shape_cast %32 : vector<64xf32> to vector<64x1xf32>
    %c448 = arith.constant 448 : index
    %c0_11 = arith.constant 0 : index
    %34 = vector.load %arg2[%c448, %c0_11] : memref<592x128xf32, #tpu.memory_space<vmem>>, vector<64x128xf32>
    %cst_12 = arith.constant dense<0.000000e+00> : vector<64x16xf32>
    %35 = tpu.matmul %34, %20, %cst_12 {dimension_numbers = #tpu.dot_dimension_numbers<[1], [1], [0], [0], [0, 0, 1, 0], [], []>} : vector<64x128xf32>, vector<16x128xf32>, vector<64x16xf32> -> vector<64x16xf32>
    %36 = arith.mulf %31, %35 : vector<64x16xf32>
    %cst_13 = arith.constant dense<0.000000e+00> : vector<64xf32>
    %37 = vector.multi_reduction <add>, %36, %cst_13 [1] : vector<64x16xf32> to vector<64xf32>
    %38 = vector.shape_cast %37 : vector<64xf32> to vector<64x1xf32>
    %39 = arith.divf %38, %33 : vector<64x1xf32>
    %40 = vector.extract_strided_slice %39 {offsets = [0, 0], sizes = [16, 1], strides = [1, 1]} : vector<64x1xf32> to vector<16x1xf32>
    %41 = vector.extract_strided_slice %39 {offsets = [16, 0], sizes = [16, 1], strides = [1, 1]} : vector<64x1xf32> to vector<16x1xf32>
    %42 = arith.addf %40, %41 : vector<16x1xf32>
    %43 = vector.extract_strided_slice %39 {offsets = [32, 0], sizes = [16, 1], strides = [1, 1]} : vector<64x1xf32> to vector<16x1xf32>
    %44 = arith.addf %42, %43 : vector<16x1xf32>
    %45 = vector.extract_strided_slice %39 {offsets = [48, 0], sizes = [16, 1], strides = [1, 1]} : vector<64x1xf32> to vector<16x1xf32>
    %46 = arith.addf %44, %45 : vector<16x1xf32>
    %c582 = arith.constant 582 : index
    %c0_14 = arith.constant 0 : index
    %47 = vector.load %arg2[%c582, %c0_14] : memref<592x128xf32, #tpu.memory_space<vmem>>, vector<1x128xf32>
    %48 = vector.broadcast %46 : vector<16x1xf32> to vector<16x128xf32>
    %49 = vector.broadcast %47 : vector<1x128xf32> to vector<16x128xf32>
    %50 = arith.mulf %48, %49 : vector<16x128xf32>
    %c583 = arith.constant 583 : index
    %c0_15 = arith.constant 0 : index
    %51 = vector.load %arg2[%c583, %c0_15] : memref<592x128xf32, #tpu.memory_space<vmem>>, vector<1x128xf32>
    %52 = vector.broadcast %51 : vector<1x128xf32> to vector<16x128xf32>
    %53 = arith.addf %50, %52 : vector<16x128xf32>
    %cst_16 = arith.constant 5.000000e-01 : f32
    %54 = vector.broadcast %cst_16 : f32 to vector<16x128xf32>
    %55 = arith.mulf %54, %53 : vector<16x128xf32>
    %cst_17 = arith.constant 0.707106769 : f32
    %56 = vector.broadcast %cst_17 : f32 to vector<16x128xf32>
    %57 = arith.mulf %53, %56 : vector<16x128xf32>
    %58 = math.absf %57 : vector<16x128xf32>
    %cst_18 = arith.constant 0.327591091 : f32
    %59 = vector.broadcast %cst_18 : f32 to vector<16x128xf32>
    %60 = arith.mulf %59, %58 : vector<16x128xf32>
    %cst_19 = arith.constant 1.000000e+00 : f32
    %61 = vector.broadcast %cst_19 : f32 to vector<16x128xf32>
    %62 = arith.addf %61, %60 : vector<16x128xf32>
    %cst_20 = arith.constant 1.000000e+00 : f32
    %63 = vector.broadcast %cst_20 : f32 to vector<16x128xf32>
    %64 = arith.divf %63, %62 : vector<16x128xf32>
    %cst_21 = arith.constant 1.06140542 : f32
    %65 = vector.broadcast %cst_21 : f32 to vector<16x128xf32>
    %66 = arith.mulf %65, %64 : vector<16x128xf32>
    %cst_22 = arith.constant -1.45315206 : f32
    %67 = vector.broadcast %cst_22 : f32 to vector<16x128xf32>
    %68 = arith.addf %66, %67 : vector<16x128xf32>
    %69 = arith.mulf %68, %64 : vector<16x128xf32>
    %cst_23 = arith.constant 1.42141378 : f32
    %70 = vector.broadcast %cst_23 : f32 to vector<16x128xf32>
    %71 = arith.addf %69, %70 : vector<16x128xf32>
    %72 = arith.mulf %71, %64 : vector<16x128xf32>
    %cst_24 = arith.constant -0.284496725 : f32
    %73 = vector.broadcast %cst_24 : f32 to vector<16x128xf32>
    %74 = arith.addf %72, %73 : vector<16x128xf32>
    %75 = arith.mulf %74, %64 : vector<16x128xf32>
    %cst_25 = arith.constant 0.254829586 : f32
    %76 = vector.broadcast %cst_25 : f32 to vector<16x128xf32>
    %77 = arith.addf %75, %76 : vector<16x128xf32>
    %78 = arith.mulf %77, %64 : vector<16x128xf32>
    %cst_26 = arith.constant 0.000000e+00 : f32
    %79 = vector.broadcast %cst_26 : f32 to vector<16x128xf32>
    %80 = arith.subf %79, %58 : vector<16x128xf32>
    %81 = arith.mulf %80, %58 : vector<16x128xf32>
    %82 = math.exp %81 : vector<16x128xf32>
    %83 = arith.mulf %78, %82 : vector<16x128xf32>
    %cst_27 = arith.constant 1.000000e+00 : f32
    %84 = vector.broadcast %cst_27 : f32 to vector<16x128xf32>
    %85 = arith.subf %84, %83 : vector<16x128xf32>
    %cst_28 = arith.constant 0.000000e+00 : f32
    %86 = vector.broadcast %cst_28 : f32 to vector<16x128xf32>
    %87 = arith.cmpf oge, %57, %86 : vector<16x128xf32>
    %cst_29 = arith.constant 0.000000e+00 : f32
    %88 = vector.broadcast %cst_29 : f32 to vector<16x128xf32>
    %89 = arith.subf %88, %85 : vector<16x128xf32>
    %90 = arith.select %87, %85, %89 : vector<16x128xi1>, vector<16x128xf32>
    %cst_30 = arith.constant 1.000000e+00 : f32
    %91 = vector.broadcast %cst_30 : f32 to vector<16x128xf32>
    %92 = arith.addf %91, %90 : vector<16x128xf32>
    %93 = arith.mulf %55, %92 : vector<16x128xf32>
    %c0_31 = arith.constant 0 : index
    %c0_32 = arith.constant 0 : index
    %94 = vector.load %arg2[%c0_31, %c0_32] : memref<592x128xf32, #tpu.memory_space<vmem>>, vector<128x128xf32>
    %cst_33 = arith.constant dense<0.000000e+00> : vector<16x128xf32>
    %95 = tpu.matmul %93, %94, %cst_33 {dimension_numbers = #tpu.dot_dimension_numbers<[1], [0], [0], [1], [0, 0, 1, 1], [], []>} : vector<16x128xf32>, vector<128x128xf32>, vector<16x128xf32> -> vector<16x128xf32>
    %c584 = arith.constant 584 : index
    %c0_34 = arith.constant 0 : index
    %96 = vector.load %arg2[%c584, %c0_34] : memref<592x128xf32, #tpu.memory_space<vmem>>, vector<1x128xf32>
    %97 = vector.broadcast %96 : vector<1x128xf32> to vector<16x128xf32>
    %98 = arith.addf %95, %97 : vector<16x128xf32>
    %cst_35 = arith.constant 5.000000e-01 : f32
    %99 = vector.broadcast %cst_35 : f32 to vector<16x128xf32>
    %100 = arith.mulf %99, %98 : vector<16x128xf32>
    %cst_36 = arith.constant 0.707106769 : f32
    %101 = vector.broadcast %cst_36 : f32 to vector<16x128xf32>
    %102 = arith.mulf %98, %101 : vector<16x128xf32>
    %103 = math.absf %102 : vector<16x128xf32>
    %cst_37 = arith.constant 0.327591091 : f32
    %104 = vector.broadcast %cst_37 : f32 to vector<16x128xf32>
    %105 = arith.mulf %104, %103 : vector<16x128xf32>
    %cst_38 = arith.constant 1.000000e+00 : f32
    %106 = vector.broadcast %cst_38 : f32 to vector<16x128xf32>
    %107 = arith.addf %106, %105 : vector<16x128xf32>
    %cst_39 = arith.constant 1.000000e+00 : f32
    %108 = vector.broadcast %cst_39 : f32 to vector<16x128xf32>
    %109 = arith.divf %108, %107 : vector<16x128xf32>
    %cst_40 = arith.constant 1.06140542 : f32
    %110 = vector.broadcast %cst_40 : f32 to vector<16x128xf32>
    %111 = arith.mulf %110, %109 : vector<16x128xf32>
    %cst_41 = arith.constant -1.45315206 : f32
    %112 = vector.broadcast %cst_41 : f32 to vector<16x128xf32>
    %113 = arith.addf %111, %112 : vector<16x128xf32>
    %114 = arith.mulf %113, %109 : vector<16x128xf32>
    %cst_42 = arith.constant 1.42141378 : f32
    %115 = vector.broadcast %cst_42 : f32 to vector<16x128xf32>
    %116 = arith.addf %114, %115 : vector<16x128xf32>
    %117 = arith.mulf %116, %109 : vector<16x128xf32>
    %cst_43 = arith.constant -0.284496725 : f32
    %118 = vector.broadcast %cst_43 : f32 to vector<16x128xf32>
    %119 = arith.addf %117, %118 : vector<16x128xf32>
    %120 = arith.mulf %119, %109 : vector<16x128xf32>
    %cst_44 = arith.constant 0.254829586 : f32
    %121 = vector.broadcast %cst_44 : f32 to vector<16x128xf32>
    %122 = arith.addf %120, %121 : vector<16x128xf32>
    %123 = arith.mulf %122, %109 : vector<16x128xf32>
    %cst_45 = arith.constant 0.000000e+00 : f32
    %124 = vector.broadcast %cst_45 : f32 to vector<16x128xf32>
    %125 = arith.subf %124, %103 : vector<16x128xf32>
    %126 = arith.mulf %125, %103 : vector<16x128xf32>
    %127 = math.exp %126 : vector<16x128xf32>
    %128 = arith.mulf %123, %127 : vector<16x128xf32>
    %cst_46 = arith.constant 1.000000e+00 : f32
    %129 = vector.broadcast %cst_46 : f32 to vector<16x128xf32>
    %130 = arith.subf %129, %128 : vector<16x128xf32>
    %cst_47 = arith.constant 0.000000e+00 : f32
    %131 = vector.broadcast %cst_47 : f32 to vector<16x128xf32>
    %132 = arith.cmpf oge, %102, %131 : vector<16x128xf32>
    %cst_48 = arith.constant 0.000000e+00 : f32
    %133 = vector.broadcast %cst_48 : f32 to vector<16x128xf32>
    %134 = arith.subf %133, %130 : vector<16x128xf32>
    %135 = arith.select %132, %130, %134 : vector<16x128xi1>, vector<16x128xf32>
    %cst_49 = arith.constant 1.000000e+00 : f32
    %136 = vector.broadcast %cst_49 : f32 to vector<16x128xf32>
    %137 = arith.addf %136, %135 : vector<16x128xf32>
    %138 = arith.mulf %100, %137 : vector<16x128xf32>
    %c128 = arith.constant 128 : index
    %c0_50 = arith.constant 0 : index
    %139 = vector.load %arg2[%c128, %c0_50] : memref<592x128xf32, #tpu.memory_space<vmem>>, vector<128x128xf32>
    %cst_51 = arith.constant dense<0.000000e+00> : vector<16x128xf32>
    %140 = tpu.matmul %138, %139, %cst_51 {dimension_numbers = #tpu.dot_dimension_numbers<[1], [0], [0], [1], [0, 0, 1, 1], [], []>} : vector<16x128xf32>, vector<128x128xf32>, vector<16x128xf32> -> vector<16x128xf32>
    %c585 = arith.constant 585 : index
    %c0_52 = arith.constant 0 : index
    %141 = vector.load %arg2[%c585, %c0_52] : memref<592x128xf32, #tpu.memory_space<vmem>>, vector<1x128xf32>
    %142 = vector.broadcast %141 : vector<1x128xf32> to vector<16x128xf32>
    %143 = arith.addf %140, %142 : vector<16x128xf32>
    %cst_53 = arith.constant 5.000000e-01 : f32
    %144 = vector.broadcast %cst_53 : f32 to vector<16x128xf32>
    %145 = arith.mulf %144, %143 : vector<16x128xf32>
    %cst_54 = arith.constant 0.707106769 : f32
    %146 = vector.broadcast %cst_54 : f32 to vector<16x128xf32>
    %147 = arith.mulf %143, %146 : vector<16x128xf32>
    %148 = math.absf %147 : vector<16x128xf32>
    %cst_55 = arith.constant 0.327591091 : f32
    %149 = vector.broadcast %cst_55 : f32 to vector<16x128xf32>
    %150 = arith.mulf %149, %148 : vector<16x128xf32>
    %cst_56 = arith.constant 1.000000e+00 : f32
    %151 = vector.broadcast %cst_56 : f32 to vector<16x128xf32>
    %152 = arith.addf %151, %150 : vector<16x128xf32>
    %cst_57 = arith.constant 1.000000e+00 : f32
    %153 = vector.broadcast %cst_57 : f32 to vector<16x128xf32>
    %154 = arith.divf %153, %152 : vector<16x128xf32>
    %cst_58 = arith.constant 1.06140542 : f32
    %155 = vector.broadcast %cst_58 : f32 to vector<16x128xf32>
    %156 = arith.mulf %155, %154 : vector<16x128xf32>
    %cst_59 = arith.constant -1.45315206 : f32
    %157 = vector.broadcast %cst_59 : f32 to vector<16x128xf32>
    %158 = arith.addf %156, %157 : vector<16x128xf32>
    %159 = arith.mulf %158, %154 : vector<16x128xf32>
    %cst_60 = arith.constant 1.42141378 : f32
    %160 = vector.broadcast %cst_60 : f32 to vector<16x128xf32>
    %161 = arith.addf %159, %160 : vector<16x128xf32>
    %162 = arith.mulf %161, %154 : vector<16x128xf32>
    %cst_61 = arith.constant -0.284496725 : f32
    %163 = vector.broadcast %cst_61 : f32 to vector<16x128xf32>
    %164 = arith.addf %162, %163 : vector<16x128xf32>
    %165 = arith.mulf %164, %154 : vector<16x128xf32>
    %cst_62 = arith.constant 0.254829586 : f32
    %166 = vector.broadcast %cst_62 : f32 to vector<16x128xf32>
    %167 = arith.addf %165, %166 : vector<16x128xf32>
    %168 = arith.mulf %167, %154 : vector<16x128xf32>
    %cst_63 = arith.constant 0.000000e+00 : f32
    %169 = vector.broadcast %cst_63 : f32 to vector<16x128xf32>
    %170 = arith.subf %169, %148 : vector<16x128xf32>
    %171 = arith.mulf %170, %148 : vector<16x128xf32>
    %172 = math.exp %171 : vector<16x128xf32>
    %173 = arith.mulf %168, %172 : vector<16x128xf32>
    %cst_64 = arith.constant 1.000000e+00 : f32
    %174 = vector.broadcast %cst_64 : f32 to vector<16x128xf32>
    %175 = arith.subf %174, %173 : vector<16x128xf32>
    %cst_65 = arith.constant 0.000000e+00 : f32
    %176 = vector.broadcast %cst_65 : f32 to vector<16x128xf32>
    %177 = arith.cmpf oge, %147, %176 : vector<16x128xf32>
    %cst_66 = arith.constant 0.000000e+00 : f32
    %178 = vector.broadcast %cst_66 : f32 to vector<16x128xf32>
    %179 = arith.subf %178, %175 : vector<16x128xf32>
    %180 = arith.select %177, %175, %179 : vector<16x128xi1>, vector<16x128xf32>
    %cst_67 = arith.constant 1.000000e+00 : f32
    %181 = vector.broadcast %cst_67 : f32 to vector<16x128xf32>
    %182 = arith.addf %181, %180 : vector<16x128xf32>
    %183 = arith.mulf %145, %182 : vector<16x128xf32>
    %c586 = arith.constant 586 : index
    %c0_68 = arith.constant 0 : index
    %184 = vector.load %arg2[%c586, %c0_68] : memref<592x128xf32, #tpu.memory_space<vmem>>, vector<1x128xf32>
    %cst_69 = arith.constant dense<0.000000e+00> : vector<1x16xf32>
    %185 = tpu.matmul %184, %183, %cst_69 {dimension_numbers = #tpu.dot_dimension_numbers<[1], [1], [0], [0], [0, 0, 1, 0], [], []>} : vector<1x128xf32>, vector<16x128xf32>, vector<1x16xf32> -> vector<1x16xf32>
    %c0_70 = arith.constant 0 : index
    %c0_71 = arith.constant 0 : index
    %186 = vector.load %arg1[%c0_70, %c0_71] : memref<2x128xf32, #tpu.memory_space<vmem>>, vector<2x128xf32>
    %c256 = arith.constant 256 : index
    %c0_72 = arith.constant 0 : index
    %187 = vector.load %arg2[%c256, %c0_72] : memref<592x128xf32, #tpu.memory_space<vmem>>, vector<128x128xf32>
    %cst_73 = arith.constant dense<0.000000e+00> : vector<2x128xf32>
    %188 = tpu.matmul %186, %187, %cst_73 {dimension_numbers = #tpu.dot_dimension_numbers<[1], [0], [0], [1], [0, 0, 1, 1], [], []>} : vector<2x128xf32>, vector<128x128xf32>, vector<2x128xf32> -> vector<2x128xf32>
    %c587 = arith.constant 587 : index
    %c0_74 = arith.constant 0 : index
    %189 = vector.load %arg2[%c587, %c0_74] : memref<592x128xf32, #tpu.memory_space<vmem>>, vector<1x128xf32>
    %190 = vector.broadcast %189 : vector<1x128xf32> to vector<2x128xf32>
    %191 = arith.addf %188, %190 : vector<2x128xf32>
    %c0_75 = arith.constant 0 : index
    %c0_76 = arith.constant 0 : index
    %192 = vector.load %arg3[%c0_75, %c0_76] : memref<4x128xf32, #tpu.memory_space<vmem>>, vector<2x128xf32>
    tpu.vector_store %arg3[%c0_75, %c0_76], %191 {strides = array<i32>} : memref<4x128xf32, #tpu.memory_space<vmem>>, vector<2x128xf32>,
    %c588 = arith.constant 588 : index
    %c0_77 = arith.constant 0 : index
    %193 = vector.load %arg2[%c588, %c0_77] : memref<592x128xf32, #tpu.memory_space<vmem>>, vector<1x16xf32>
    %194 = arith.addf %185, %193 : vector<1x16xf32>
    %c2 = arith.constant 2 : index
    %c0_78 = arith.constant 0 : index
    %195 = vector.load %arg3[%c2, %c0_78] : memref<4x128xf32, #tpu.memory_space<vmem>>, vector<1x16xf32>
    tpu.vector_store %arg3[%c2, %c0_78], %194 {strides = array<i32>} : memref<4x128xf32, #tpu.memory_space<vmem>>, vector<1x16xf32>,
    return
  }
}

</mosaic_0001>

<bundles_post_ra>
// kernel: squeeze.5
= control target key start
LH: loop header
LB: loop body
LE: loop exit
PB: predicated region body
PF: predicated region fallthrough
CT: control target
= control target key end

     0   :  { %s85_s0 = inlined_call_operand.vmem [shape: f32[16], index: 0, kind: input, shape index: {}]   ;;  %s86_s1 = inlined_call_operand.hbm [shape: f32[2,8,1], index: 1, kind: output, shape index: {}]  }
   0x1   :  { %v5_v0 = vld [vmem:[%s85_s0] sm:$0x1] }
   0x2   :  { %2 = vsyncpa [#allocation1], 0  ;;  %6 = vst [vmem:[#allocation3] sm:$0x1] %v5_v0  ;;  %vm8_vm0 = vcmask 64512   ;;  %s58_s0 = smov 120  }
   0x3   :  { %s59_s8 = smov [#allocation0]  }
   0x4   :  { %s26_s9 = sshll.u32 %s59_s8, 4  ;;  %s27_s9 = int_to_ptr.vmem [resolvable:$true] %s26_s9 }
   0x5   :  { %s34_s10 = scalar_lea.vmem %s27_s9, 32  ;;  %p39_p1 = scmp.lt.s32.totalorder %s27_s9, %s27_s9 }
   0x6   :  { %p35_p0 = scmp.ne.s32.totalorder %s27_s9, %s34_s10  ;;  %p40_p2 = scmp.lt.s32.totalorder %s34_s10, %s34_s10 }
   0x8   :  { %p41_p3 = por %p40_p2, %p39_p1 }
   0x9   :  { %v10_v1 = vld [vmem:[#allocation3] sm:$0x1]  }
   0xa   :  { %v7_v2 = vld [vmem:[#allocation3] sm:$0x1]   ;;  %11 = vrot.lane.b32.xlu0 %v10_v1, %s58_s0  ;;  %p42_p4 = pnand %p41_p3, %p35_p0 }
   0xb   :  { %9 = vst.msk [vmem:[#allocation2] sm:$0x1] %vm8_vm0, %v7_v2  }
  0x7c   :  { %v12_v3 = vpop.permute.xlu0 %11  }
  0x7d   :  { %15 = vst.msk [vmem:[#allocation2 + $0x1] sm:$0x1] %vm8_vm0, %v12_v3  }
  0x84   :  { %v19_v4 = vld [vmem:[#allocation2] sm:$0x3] }
  0x85   :  { %21 = vst [vmem:[#allocation0] sm:$0x3] %v19_v4 }
  0x86   :  { %45 = shalt.err (!%p42_p4)
}
  0x87   :  { %s46_s13 = scalar_lea.hbm %s86_s1, 32 }
  0x88   :  { %p47_p5 = scmp.ne.s32.totalorder %s86_s1, %s46_s13  ;;  %p50_p6 = scmp.lt.u32.totalorder %s46_s13, %s86_s1 }
  0x8a   :  { %p52_p7 = pnand %p50_p6, %p47_p5 }
  0x8c   :  { %55 = shalt.err (!%p52_p7)
}
  0x8d   :  { %29 = dma.vmem_to_hbm [thread:$0]  %s27_s9, 32, %s86_s1, [#allocation1]  }
  0x8e   :  { %56 = dma.done.wait [#allocation1], 32  }
  0x8f   :  { %57 = vsyncadd [#allocation1], 4294967264 }
  0x90   :  { %31 = vsyncpa [#allocation1], 1 }

// kernel: ozone_forward.1
= control target key start
LH: loop header
LB: loop body
LE: loop exit
PB: predicated region body
PF: predicated region fallthrough
CT: control target
= control target key end

     0   :  { %8 = vsyncpa [#allocation3], 0  ;;  %s1409_s12 = smov [#allocation2]   ;;  %s1505_s0 = inlined_call_operand.vmem [shape: f32[16,1], index: 0, kind: input, shape index: {}]   ;;  %s1506_s1 = inlined_call_operand.vmem [shape: f32[2,128], index: 1, kind: input, shape index: {}]   ;;  %s1507_s2 = inlined_call_operand.hbm [shape: f32[592,128], index: 2, kind: input, shape index: {}]   ;;  %s1508_s3 = inlined_call_operand.vmem [shape: f32[4,128], index: 3, kind: output, shape index: {}]  }
   0x1   :  { %s18_s13 = sshll.u32 %s1409_s12, 4  ;;  %s1385_s16 = scalar_lea.hbm %s1507_s2, 9472  ;;  %s19_s13 = int_to_ptr.vmem [resolvable:$true] %s18_s13 }
   0x2   :  { %p1386_p0 = scmp.ne.s32.totalorder %s1507_s2, %s1385_s16  ;;  %p1389_p1 = scmp.lt.u32.totalorder %s1385_s16, %s1507_s2 }
   0x4   :  { %p1391_p2 = pnand %p1389_p1, %p1386_p0 }
   0x6   :  { %1394 = shalt.err (!%p1391_p2)
}
   0x7   :  { %s1395_s21 = scalar_lea.vmem %s19_s13, 9472  ;;  %p1400_p4 = scmp.lt.s32.totalorder %s19_s13, %s19_s13 }
   0x8   :  { %p1396_p3 = scmp.ne.s32.totalorder %s19_s13, %s1395_s21  ;;  %p1401_p5 = scmp.lt.s32.totalorder %s1395_s21, %s1395_s21 }
   0xa   :  { %p1402_p6 = por %p1401_p5, %p1400_p4 }
   0xc   :  { %p1403_p7 = pnand %p1402_p6, %p1396_p3 }
   0xe   :  { %1406 = shalt.err (!%p1403_p7)
}
   0xf   :  { %s1410_s22 = smov 128   ;;  %s1411_s23 = smov 8  }
  0x10   :  { %24 = dma.hbm_to_vmem [thread:$0]  %s1507_s2, 9472, %s19_s13, [#allocation3], %s1410_s22, %s1410_s22, %s1411_s23  }
  0x11   :  { %1407 = dma.done.wait [#allocation3], 9472  }
  0x12   :  { %1408 = vsyncadd [#allocation3], 4294957824  ;;  %v1412_v0 = vmov 0   ;;  %v28_v1 = vld [vmem:[%s1505_s0] sm:$0xff]  ;;  %v29_v2 = vld [vmem:[%s1505_s0 + $0x8] sm:$0xff]  ;;  %vm211_vm0 = vcmask 130048  }
  0x13   :  { %1328 = vset.pattern.permute.xlu0 %v1412_v0  ;;  %v991_v3 = vld [vmem:[#allocation2 + $0x240] ss:$0 sm:$0xff]  ;;  %v992_v4 = vld [vmem:[#allocation2 + $0x241] ss:$0 sm:$0xff]  ;;  %v993_v5 = vld [vmem:[#allocation2 + $0x242] ss:$0 sm:$0xff] }
  0x14   :  { %32 = vperm.xlu0 %1328, %v28_v1   ;;  %v995_v8 = vld [vmem:[#allocation2 + $0x244] ss:$0 sm:$0xff]  ;;  %v994_v13 = vld [vmem:[#allocation2 + $0x243] ss:$0 sm:$0xff]  ;;  %v996_v18 = vld [vmem:[#allocation2 + $0x245] ss:$0 sm:$0xff] }
  0x15   :  { %v82_v9 = vld [vmem:[#allocation2 + $0x180] sm:$0xff]  ;;  %v83_v27 = vld [vmem:[#allocation2 + $0x188] sm:$0xff]  ;;  %v84_v28 = vld [vmem:[#allocation2 + $0x190] sm:$0xff]  ;;  %vm1414_vm5 = vmmov 0   ;;  %vm984_vm8 = vcmask 122880  }
  0x16   :  { %v85_v31 = vld [vmem:[#allocation2 + $0x198] sm:$0xff]  ;;  %v86_v32 = vld [vmem:[#allocation2 + $0x1a0] sm:$0xff]  ;;  %v87_v35 = vld [vmem:[#allocation2 + $0x1a8] sm:$0xff] }
  0x17   :  { %v88_v36 = vld [vmem:[#allocation2 + $0x1b0] sm:$0xff]  ;;  %v89_v39 = vld [vmem:[#allocation2 + $0x1b8] sm:$0xff]  ;;  %v284_v41 = vld [vmem:[#allocation2 + $0x1c0] sm:$0xff] }
  0x18   :  { %37 = vperm.xlu0 %1328, %v29_v2   ;;  %v285_v42 = vld [vmem:[#allocation2 + $0x1c8] sm:$0xff]  ;;  %v286_v43 = vld [vmem:[#allocation2 + $0x1d0] sm:$0xff]  ;;  %v287_v44 = vld [vmem:[#allocation2 + $0x1d8] sm:$0xff] }
  0x19   :  { %v288_v45 = vld [vmem:[#allocation2 + $0x1e0] sm:$0xff]  ;;  %v289_v46 = vld [vmem:[#allocation2 + $0x1e8] sm:$0xff]  ;;  %v290_v47 = vld [vmem:[#allocation2 + $0x1f0] sm:$0xff] }
  0x1a   :  { %v291_v48 = vld [vmem:[#allocation2 + $0x1f8] sm:$0xff]  ;;  %v99_v49 = vld [vmem:[#allocation2 + $0x208] sm:$0xff]  ;;  %v98_v50 = vld [vmem:[#allocation2 + $0x200] sm:$0xff] }
  0x1b   :  { %v101_v55 = vld [vmem:[#allocation2 + $0x218] sm:$0xff]  ;;  %v100_v61 = vld [vmem:[#allocation2 + $0x210] sm:$0xff]  ;;  %v103_v1 = vld [vmem:[#allocation2 + $0x228] sm:$0xff] }
  0x93   :  { %v33_v6 = vpop.permute.xlu0 %32 }
  0x94   :  { %v45_v7 = vmul.f32 %v991_v3, %v33_v6  ;;  %v59_v11 = vmul.f32 %v993_v5, %v33_v6  ;;  %v73_v14 = vmul.f32 %v995_v8, %v33_v6  ;;  %v102_v6 = vld [vmem:[#allocation2 + $0x220] sm:$0xff] }
  0x96   :  { %v52_v10 = vadd.f32 %v992_v4, %v45_v7  ;;  %v66_v20 = vadd.f32 %v994_v13, %v59_v11  ;;  %v80_v22 = vadd.f32 %v996_v18, %v73_v14 }
  0x97   :  { %v38_v12 = vpop.permute.xlu0 %37 }
  0x98   :  { %v60_v15 = vmul.f32 %v993_v5, %v38_v12  ;;  %v74_v16 = vmul.f32 %v995_v8, %v38_v12  ;;  %v90_v17 = vmul.f32 %v82_v9, %v52_v10  ;;  %v46_v23 = vmul.f32 %v991_v3, %v38_v12 }
  0x99   :  { %v92_v30 = vmul.f32 %v84_v28, %v52_v10  ;;  %v94_v34 = vmul.f32 %v86_v32, %v52_v10  ;;  %v96_v38 = vmul.f32 %v88_v36, %v52_v10  ;;  %v104_v10 = vld [vmem:[#allocation2 + $0x230] sm:$0xff] }
  0x9a   :  { %v81_v19 = vadd.f32 %v996_v18, %v74_v16  ;;  %1082 = vmatprep.mubr.f32.mxu1 %v90_v17  ;;  %v67_v21 = vadd.f32 %v994_v13, %v60_v15  ;;  %v53_v26 = vadd.f32 %v992_v4, %v46_v23  ;;  %v105_v13 = vld [vmem:[#allocation2 + $0x238] sm:$0xff] }
  0x9c   :  { %v1222_v24 = vpack.c.bf16 %v67_v21, %v66_v20  ;;  %v1226_v25 = vpack.c.bf16 %v81_v19, %v80_v22  ;;  %v91_v29 = vmul.f32 %v83_v27, %v53_v26  ;;  %v93_v33 = vmul.f32 %v85_v31, %v53_v26 }
  0x9d   :  { %v95_v37 = vmul.f32 %v87_v35, %v53_v26  ;;  %v97_v40 = vmul.f32 %v89_v39, %v53_v26 }
  0x9e   :  { %1223 = vmatprep.subr.bf16.mxu1 %v1222_v24 }
  0x9f   :  { %1225 = vmatpush3.bf16.xpose.msra.mxu1 %v1222_v24 }
  0xa0   :  { %1227 = vmatprep.subr.bf16.mxu1 %v1226_v25 }
  0xa6   :  { %1083 = vmatmul.mubr.f32.vlgmr.msra.gmra.mrb[0].mxu1 %v91_v29 }
  0xa7   :  { %1085 = vmatprep.mubr.f32.mxu1 %v92_v30  ;;  %1229 = vmatpush3.bf16.xpose.msra.mxu1 %v1226_v25 }
  0xaa   :  { %1086 = vmatmul.mubr.f32.gmra.mrb[2].mxu1 %v93_v33 }
  0xab   :  { %1088 = vmatprep.mubr.f32.mxu1 %v94_v34 }
  0xae   :  { %1089 = vmatmul.mubr.f32.gmra.mrb[4].mxu1 %v95_v37 }
  0xaf   :  { %1091 = vmatprep.mubr.f32.mxu1 %v96_v38 }
  0xb2   :  { %1092 = vmatmul.mubr.f32.gmra.mrb[6].mxu1 %v97_v40 }
  0xb3   :  { %1098 = vmatprep.mubr.f32.mxu1 %v284_v41 }
  0xb6   :  { %1099 = vmatmul.mubr.f32.vlgmr.msra.gmra.mrb[8].mxu1 %v285_v42 }
  0xb7   :  { %1101 = vmatprep.mubr.f32.mxu1 %v286_v43 }
  0xba   :  { %1102 = vmatmul.mubr.f32.gmra.mrb[10].mxu1 %v287_v44 }
  0xbb   :  { %1104 = vmatprep.mubr.f32.mxu1 %v288_v45 }
  0xbe   :  { %1105 = vmatmul.mubr.f32.gmra.mrb[12].mxu1 %v289_v46 }
  0xbf   :  { %1107 = vmatprep.mubr.f32.mxu1 %v290_v47 }
  0xc2   :  { %1108 = vmatmul.mubr.f32.gmra.mrb[14].mxu1 %v291_v48 }
 0x179   :  { %v1084_v51 = vpop.f32.mrb[0].mxu1 }
 0x17a   :  { %v178_v52 = vadd.f32 %v1084_v51, %v99_v49  ;;  %v172_v53 = vpop.f32.mrb[1].mxu1 }
 0x17b   :  { %v173_v54 = vadd.f32 %v172_v53, %v98_v50 }
 0x17c   :  { %v215_v56 = vsel %vm211_vm0, %v178_v52, -inf }
 0x17d   :  { %216 = vmax.xlane.f32.xlu0 %v215_v56  ;;  %v1087_v57 = vpop.f32.mrb[2].mxu1  ;;  %v212_v58 = vsel %vm211_vm0, %v173_v54, -inf }
 0x17e   :  { %v188_v59 = vadd.f32 %v1087_v57, %v101_v55  ;;  %v182_v60 = vpop.f32.mrb[3].mxu1  ;;  %213 = vmax.xlane.f32.xlu1 %v212_v58 }
 0x17f   :  { %v183_v63 = vadd.f32 %v182_v60, %v100_v61 }
 0x180   :  { %v221_v62 = vsel %vm211_vm0, %v188_v59, -inf }
 0x181   :  { %v1090_v0 = vpop.f32.mrb[4].mxu1  ;;  %v218_v5 = vsel %vm211_vm0, %v183_v63, -inf }
 0x182   :  { %v192_v2 = vpop.f32.mrb[5].mxu1  ;;  %222 = vmax.xlane.f32.xlu1 %v221_v62  ;;  %v198_v3 = vadd.f32 %v1090_v0, %v103_v1 }
 0x183   :  { %v193_v8 = vadd.f32 %v192_v2, %v102_v6 }
 0x184   :  { %v227_v9 = vsel %vm211_vm0, %v198_v3, -inf }
 0x185   :  { %v1093_v4 = vpop.f32.mrb[6].mxu1  ;;  %v224_v12 = vsel %vm211_vm0, %v193_v8, -inf }
 0x186   :  { %v202_v7 = vpop.f32.mrb[7].mxu1  ;;  %219 = vmax.xlane.f32.xlu1 %v218_v5  ;;  %v208_v14 = vadd.f32 %v1093_v4, %v105_v13 }
 0x187   :  { %v203_v11 = vadd.f32 %v202_v7, %v104_v10 }
 0x188   :  { %v233_v16 = vsel %vm211_vm0, %v208_v14, -inf }
 0x189   :  { %v230_v15 = vsel %vm211_vm0, %v203_v11, -inf  ;;  %v1462_v17 = vpop.f32.mrb[8].mxu1 }
 0x18a   :  { %228 = vmax.xlane.f32.xlu1 %v227_v9  ;;  %v358_v18 = vpop.f32.mrb[9].mxu1 }
 0x18d   :  { %v1464_v19 = vpop.f32.mrb[10].mxu1 }
 0x18e   :  { %225 = vmax.xlane.f32.xlu1 %v224_v12  ;;  %v368_v20 = vpop.f32.mrb[11].mxu1 }
 0x191   :  { %v1466_v21 = vpop.f32.mrb[12].mxu1 }
 0x192   :  { %231 = vmax.xlane.f32.xlu1 %v230_v15  ;;  %v1468_v22 = vpop.f32.mrb[13].mxu1 }
 0x195   :  { %v1470_v23 = vpop.f32.mrb[14].mxu1 }
 0x196   :  { %234 = vmax.xlane.f32.xlu1 %v233_v16  ;;  %v1472_v24 = vpop.f32.mrb[15].mxu1 }
 0x20a   :  { %v217_v25 = vpop.xlane.xlu0 %216 }
 0x20b   :  { %v237_v26 = vsub.f32 %v178_v52, %v217_v25  ;;  %v214_v27 = vpop.xlane.xlu1 %213  ;;  %v524_v25 = vld [vmem:[#allocation2 + $0x28] sm:$0xff] }
 0x20c   :  { %v236_v28 = vsub.f32 %v173_v54, %v214_v27  ;;  %v526_v27 = vld [vmem:[#allocation2 + $0x38] sm:$0xff] }
 0x20d   :  { %v246_v29 = vmul.f32 1.442695, %v237_v26  ;;  %v525_v26 = vld [vmem:[#allocation2 + $0x30] sm:$0xff] }
 0x20e   :  { %v244_v30 = vmul.f32 1.442695, %v236_v28  ;;  %v1242_v28 = vpack.c.bf16 %v526_v27, %v525_v26 }
 0x20f   :  { %1329 = vpow2.f32 %v246_v29  ;;  %v223_v31 = vpop.xlane.xlu1 %222  ;;  %v527_v29 = vld [vmem:[#allocation2 + $0x40] sm:$0xff] }
 0x210   :  { %v239_v32 = vsub.f32 %v188_v59, %v223_v31  ;;  %1331 = vpow2.f32 %v244_v30  ;;  %v528_v30 = vld [vmem:[#allocation2 + $0x48] sm:$0xff] }
 0x211   :  { %v1246_v31 = vpack.c.bf16 %v528_v30, %v527_v29 }
 0x212   :  { %v250_v33 = vmul.f32 1.442695, %v239_v32  ;;  %v529_v32 = vld [vmem:[#allocation2 + $0x50] sm:$0xff] }
 0x213   :  { %v220_v34 = vpop.xlane.xlu1 %219 }
 0x214   :  { %1333 = vpow2.f32 %v250_v33  ;;  %v238_v35 = vsub.f32 %v183_v63, %v220_v34  ;;  %v530_v33 = vld [vmem:[#allocation2 + $0x58] sm:$0xff] }
 0x215   :  { %v1250_v34 = vpack.c.bf16 %v530_v33, %v529_v32 }
 0x216   :  { %v248_v36 = vmul.f32 1.442695, %v238_v35  ;;  %v531_v35 = vld [vmem:[#allocation2 + $0x60] sm:$0xff] }
 0x217   :  { %v229_v37 = vpop.xlane.xlu1 %228 }
 0x218   :  { %1335 = vpow2.f32 %v248_v36  ;;  %v241_v38 = vsub.f32 %v198_v3, %v229_v37  ;;  %v532_v36 = vld [vmem:[#allocation2 + $0x68] sm:$0xff] }
 0x219   :  { %v1330_v39 = vpop.eup %1329  ;;  %v1254_v37 = vpack.c.bf16 %v532_v36, %v531_v35 }
 0x21a   :  { %v254_v40 = vmul.f32 1.442695, %v241_v38  ;;  %v263_v41 = vsel %vm211_vm0, %v1330_v39, 0.0  ;;  %v1332_v42 = vpop.eup %1331  ;;  %v398_v2 = vmul.f32 %v1330_v39, %v1462_v17  ;;  %v519_v17 = vld [vmem:[#allocation2] sm:$0xff]  ;;  %v533_v38 = vld [vmem:[#allocation2 + $0x70] sm:$0xff]  ;;  %v534_v39 = vld [vmem:[#allocation2 + $0x78] sm:$0xff] }
 0x21b   :  { %264 = vadd.xlane.f32.xlu1 %v263_v41  ;;  %v226_v43 = vpop.xlane.xlu1 %225  ;;  %v397_v46 = vmul.f32 %v1332_v42, %v358_v18  ;;  %v260_v48 = vsel %vm211_vm0, %v1332_v42, 0.0  ;;  %v520_v18 = vld [vmem:[#allocation2 + $0x8] sm:$0xff] }
 0x21c   :  { %1337 = vpow2.f32 %v254_v40  ;;  %v240_v44 = vsub.f32 %v193_v8, %v226_v43  ;;  %v408_v7 = vsel %vm211_vm0, %v398_v2, 0.0  ;;  %v1258_v40 = vpack.c.bf16 %v534_v39, %v533_v38 }
 0x21d   :  { %v405_v54 = vsel %vm211_vm0, %v397_v46, 0.0 }
 0x21e   :  { %v1334_v45 = vpop.eup %1333  ;;  %v252_v47 = vmul.f32 1.442695, %v240_v44 }
 0x21f   :  { %261 = vadd.xlane.f32.xlu1 %v260_v48  ;;  %v232_v49 = vpop.xlane.xlu1 %231  ;;  %v269_v50 = vsel %vm211_vm0, %v1334_v45, 0.0  ;;  %v400_v5 = vmul.f32 %v1334_v45, %v1464_v19  ;;  %v521_v19 = vld [vmem:[#allocation2 + $0x10] sm:$0xff] }
 0x220   :  { %1339 = vpow2.f32 %v252_v47  ;;  %v242_v51 = vsub.f32 %v203_v11, %v232_v49  ;;  %270 = vadd.xlane.f32.xlu0 %v269_v50 }
 0x221   :  { %v414_v12 = vsel %vm211_vm0, %v400_v5, 0.0 }
 0x222   :  { %v1336_v52 = vpop.eup %1335  ;;  %v256_v53 = vmul.f32 1.442695, %v242_v51 }
 0x223   :  { %v399_v55 = vmul.f32 %v1336_v52, %v368_v20  ;;  %406 = vadd.xlane.f32.xlu1 %v405_v54  ;;  %v235_v56 = vpop.xlane.xlu1 %234  ;;  %v266_v61 = vsel %vm211_vm0, %v1336_v52, 0.0  ;;  %v1230_v20 = vpack.c.bf16 %v520_v18, %v519_v17 }
 0x224   :  { %1341 = vpow2.f32 %v256_v53  ;;  %v243_v57 = vsub.f32 %v208_v14, %v235_v56 }
 0x225   :  { %v411_v58 = vsel %vm211_vm0, %v399_v55, 0.0  ;;  %1231 = vmatprep.subr.bf16.mxu0 %v1230_v20 }
 0x226   :  { %v1338_v59 = vpop.eup %1337  ;;  %v258_v60 = vmul.f32 1.442695, %v243_v57  ;;  %412 = vadd.xlane.f32.xlu0 %v411_v58  ;;  %1233 = vmatpush3.bf16.msra.mxu0 %v1230_v20 }
 0x227   :  { %267 = vadd.xlane.f32.xlu1 %v266_v61  ;;  %v275_v62 = vsel %vm211_vm0, %v1338_v59, 0.0  ;;  %v402_v9 = vmul.f32 %v1338_v59, %v1466_v21  ;;  %v522_v21 = vld [vmem:[#allocation2 + $0x18] sm:$0xff] }
 0x228   :  { %1343 = vpow2.f32 %v258_v60 }
 0x229   :  { %v420_v15 = vsel %vm211_vm0, %v402_v9, 0.0 }
 0x22a   :  { %v1340_v63 = vpop.eup %1339  ;;  %276 = vadd.xlane.f32.xlu0 %v275_v62 }
 0x22b   :  { %v272_v0 = vsel %vm211_vm0, %v1340_v63, 0.0  ;;  %v401_v6 = vmul.f32 %v1340_v63, %v1468_v22  ;;  %v1234_v22 = vpack.c.bf16 %v522_v21, %v521_v19 }
 0x22c   :  { %273 = vadd.xlane.f32.xlu1 %v272_v0 }
 0x22d   :  { %v417_v11 = vsel %vm211_vm0, %v401_v6, 0.0  ;;  %1235 = vmatprep.subr.bf16.mxu0 %v1234_v22 }
 0x22e   :  { %v1342_v1 = vpop.eup %1341  ;;  %1237 = vmatpush3.bf16.msra.mxu0 %v1234_v22 }
 0x22f   :  { %v278_v3 = vsel %vm211_vm0, %v1342_v1, 0.0  ;;  %v403_v10 = vmul.f32 %v1342_v1, %v1472_v24  ;;  %v523_v24 = vld [vmem:[#allocation2 + $0x20] sm:$0xff] }
 0x230   :  { %279 = vadd.xlane.f32.xlu1 %v278_v3 }
 0x231   :  { %v423_v14 = vsel %vm211_vm0, %v403_v10, 0.0 }
 0x232   :  { %v1344_v4 = vpop.eup %1343 }
 0x233   :  { %v281_v8 = vsel %vm211_vm0, %v1344_v4, 0.0  ;;  %v404_v13 = vmul.f32 %v1344_v4, %v1470_v23  ;;  %v1238_v23 = vpack.c.bf16 %v524_v25, %v523_v24 }
 0x234   :  { %409 = vadd.xlane.f32.xlu1 %v408_v7  ;;  %282 = vadd.xlane.f32.xlu0 %v281_v8  ;;  %v997_v8 = vld [vmem:[#allocation2 + $0x246] ss:$0 sm:$0xff] }
 0x235   :  { %v426_v16 = vsel %vm211_vm0, %v404_v13, 0.0  ;;  %1239 = vmatprep.subr.bf16.mxu0 %v1238_v23  ;;  %v998_v13 = vld [vmem:[#allocation2 + $0x247] ss:$0 sm:$0xff] }
 0x236   :  { %1241 = vmatpush3.bf16.msra.mxu0 %v1238_v23 }
 0x237   :  { %1243 = vmatprep.subr.bf16.mxu0 %v1242_v28 }
 0x238   :  { %418 = vadd.xlane.f32.xlu1 %v417_v11  ;;  %415 = vadd.xlane.f32.xlu0 %v414_v12 }
 0x23a   :  { %1245 = vmatpush3.bf16.msra.mxu0 %v1242_v28 }
 0x23b   :  { %1247 = vmatprep.subr.bf16.mxu0 %v1246_v31 }
 0x23c   :  { %424 = vadd.xlane.f32.xlu1 %v423_v14  ;;  %421 = vadd.xlane.f32.xlu0 %v420_v15 }
 0x23e   :  { %1249 = vmatpush3.bf16.msra.mxu0 %v1246_v31 }
 0x23f   :  { %1251 = vmatprep.subr.bf16.mxu0 %v1250_v34 }
 0x240   :  { %427 = vadd.xlane.f32.xlu0 %v426_v16 }
 0x242   :  { %1253 = vmatpush3.bf16.msra.mxu0 %v1250_v34 }
 0x243   :  { %1255 = vmatprep.subr.bf16.mxu0 %v1254_v37 }
 0x246   :  { %1257 = vmatpush3.bf16.msra.mxu0 %v1254_v37 }
 0x247   :  { %1259 = vmatprep.subr.bf16.mxu0 %v1258_v40 }
 0x24a   :  { %1261 = vmatpush3.bf16.msra.mxu0 %v1258_v40 }
 0x2a8   :  { %v265_v41 = vpop.xlane.xlu1 %264 }
 0x2ac   :  { %v262_v42 = vpop.xlane.xlu1 %261 }
 0x2ad   :  { %v271_v44 = vpop.xlane.xlu0 %270 }
 0x2b0   :  { %v407_v43 = vpop.xlane.xlu1 %406 }
 0x2b3   :  { %v413_v46 = vpop.xlane.xlu0 %412 }
 0x2b4   :  { %v268_v45 = vpop.xlane.xlu1 %267 }
 0x2b5   :  { %1345 = vrcp.f32 %v268_v45 }
 0x2b6   :  { %1347 = vrcp.f32 %v262_v42 }
 0x2b7   :  { %v277_v48 = vpop.xlane.xlu0 %276 }
 0x2b9   :  { %v274_v47 = vpop.xlane.xlu1 %273 }
 0x2ba   :  { %1349 = vrcp.f32 %v274_v47 }
 0x2bb   :  { %1351 = vrcp.f32 %v265_v41 }
 0x2bc   :  { %1353 = vrcp.f32 %v271_v44 }
 0x2bd   :  { %v280_v49 = vpop.xlane.xlu1 %279 }
 0x2be   :  { %1355 = vrcp.f32 %v280_v49 }
 0x2bf   :  { %1357 = vrcp.f32 %v277_v48  ;;  %v1346_v50 = vpop.eup %1345 }
 0x2c0   :  { %v1348_v53 = vpop.eup %1347  ;;  %v434_v55 = vmul.f32 %v1346_v50, %v413_v46 }
 0x2c1   :  { %v283_v51 = vpop.xlane.xlu0 %282  ;;  %v410_v52 = vpop.xlane.xlu1 %409  ;;  %v430_v59 = vmul.f32 %v1348_v53, %v407_v43 }
 0x2c2   :  { %1359 = vrcp.f32 %v283_v51 }
 0x2c3   :  { %v445_v0 = vadd.f32 %v434_v55, %v430_v59 }
 0x2c4   :  { %v1350_v54 = vpop.eup %1349 }
 0x2c5   :  { %v416_v56 = vpop.xlane.xlu0 %415  ;;  %v419_v57 = vpop.xlane.xlu1 %418 }
 0x2c6   :  { %v1352_v58 = vpop.eup %1351  ;;  %v438_v60 = vmul.f32 %v1350_v54, %v419_v57 }
 0x2c7   :  { %v1354_v61 = vpop.eup %1353  ;;  %v432_v4 = vmul.f32 %v1352_v58, %v410_v52 }
 0x2c8   :  { %v1356_v62 = vpop.eup %1355  ;;  %v436_v63 = vmul.f32 %v1354_v61, %v416_v56  ;;  %v447_v5 = vadd.f32 %v445_v0, %v438_v60 }
 0x2c9   :  { %v1358_v1 = vpop.eup %1357  ;;  %v422_v2 = vpop.xlane.xlu0 %421 }
 0x2ca   :  { %v425_v3 = vpop.xlane.xlu1 %424  ;;  %v440_v6 = vmul.f32 %v1358_v1, %v422_v2  ;;  %v446_v10 = vadd.f32 %v436_v63, %v432_v4 }
 0x2cb   :  { %v442_v7 = vmul.f32 %v1356_v62, %v425_v3 }
 0x2cc   :  { %v1360_v9 = vpop.eup %1359  ;;  %v448_v14 = vadd.f32 %v446_v10, %v440_v6  ;;  %v671_v10 = vld [vmem:[#allocation2 + $0x90] sm:$0xff] }
 0x2cd   :  { %v449_v11 = vadd.f32 %v447_v5, %v442_v7  ;;  %v428_v12 = vpop.xlane.xlu0 %427  ;;  %v669_v7 = vld [vmem:[#allocation2 + $0x80] sm:$0xff] }
 0x2ce   :  { %v444_v16 = vmul.f32 %v1360_v9, %v428_v12 }
 0x2cf   :  { %v456_v15 = vmul.f32 %v997_v8, %v449_v11  ;;  %v672_v11 = vld [vmem:[#allocation2 + $0x98] sm:$0xff] }
 0x2d0   :  { %v450_v17 = vadd.f32 %v448_v14, %v444_v16  ;;  %v1266_v12 = vpack.c.bf16 %v672_v11, %v671_v10  ;;  %v674_v14 = vld [vmem:[#allocation2 + $0xa8] sm:$0xff]  ;;  %v675_v16 = vld [vmem:[#allocation2 + $0xb0] sm:$0xff] }
 0x2d1   :  { %v463_v18 = vadd.f32 %v998_v13, %v456_v15 }
 0x2d2   :  { %v457_v19 = vmul.f32 %v997_v8, %v450_v17  ;;  %v670_v8 = vld [vmem:[#allocation2 + $0x88] sm:$0xff]  ;;  %v676_v17 = vld [vmem:[#allocation2 + $0xb8] sm:$0xff] }
 0x2d3   :  { %v467_v20 = vmul.f32 0.70710677, %v463_v18  ;;  %v465_v63 = vmul.f32 0.5, %v463_v18  ;;  %v1262_v9 = vpack.c.bf16 %v670_v8, %v669_v7  ;;  %v1274_v18 = vpack.c.bf16 %v676_v17, %v675_v16 }
 0x2d4   :  { %v464_v21 = vadd.f32 %v998_v13, %v457_v19  ;;  %v673_v13 = vld [vmem:[#allocation2 + $0xa0] sm:$0xff] }
 0x2d5   :  { %v469_v22 = vand.u32 2147483647, %v467_v20  ;;  %vm509_vm1 = vcmp.ge.f32.partialorder %v467_v20, 0.0  ;;  %1263 = vmatprep.subr.bf16.mxu1 %v1262_v9  ;;  %v1270_v15 = vpack.c.bf16 %v674_v14, %v673_v13  ;;  %v677_v19 = vld [vmem:[#allocation2 + $0xc0] sm:$0xff]  ;;  %v678_v20 = vld [vmem:[#allocation2 + $0xc8] sm:$0xff] }
 0x2d6   :  { %v468_v24 = vmul.f32 0.70710677, %v464_v21  ;;  %v466_v4 = vmul.f32 0.5, %v464_v21  ;;  %1265 = vmatpush3.bf16.msra.mxu1 %v1262_v9  ;;  %v1278_v21 = vpack.c.bf16 %v678_v20, %v677_v19 }
 0x2d7   :  { %v471_v25 = vmul.f32 0.3275911, %v469_v22  ;;  %v497_v29 = vsub.f32 0.0, %v469_v22  ;;  %1267 = vmatprep.subr.bf16.mxu1 %v1266_v12 }
 0x2d8   :  { %v470_v23 = vand.u32 2147483647, %v468_v24  ;;  %vm510_vm2 = vcmp.ge.f32.partialorder %v468_v24, 0.0  ;;  %v680_v24 = vld [vmem:[#allocation2 + $0xd8] sm:$0xff] }
 0x2d9   :  { %v473_v26 = vadd.f32 1.0, %v471_v25  ;;  %v499_v32 = vmul.f32 %v497_v29, %v469_v22  ;;  %v679_v22 = vld [vmem:[#allocation2 + $0xd0] sm:$0xff]  ;;  %v684_v29 = vld [vmem:[#allocation2 + $0xf8] sm:$0xff] }
 0x2da   :  { %v472_v27 = vmul.f32 0.3275911, %v470_v23  ;;  %v498_v31 = vsub.f32 0.0, %v470_v23  ;;  %1269 = vmatpush3.bf16.msra.mxu1 %v1266_v12  ;;  %v1282_v25 = vpack.c.bf16 %v680_v24, %v679_v22  ;;  %v821_v22 = vld [vmem:[#allocation2 + $0x100] sm:$0xff]  ;;  %v822_v24 = vld [vmem:[#allocation2 + $0x108] sm:$0xff] }
 0x2db   :  { %1361 = vrcp.f32 %v473_v26  ;;  %v501_v37 = vmul.f32 1.442695, %v499_v32  ;;  %1271 = vmatprep.subr.bf16.mxu1 %v1270_v15  ;;  %v682_v26 = vld [vmem:[#allocation2 + $0xe8] sm:$0xff] }
 0x2dc   :  { %v474_v28 = vadd.f32 1.0, %v472_v27  ;;  %v500_v36 = vmul.f32 %v498_v31, %v470_v23  ;;  %v681_v23 = vld [vmem:[#allocation2 + $0xe0] sm:$0xff]  ;;  %v999_v31 = vld [vmem:[#allocation2 + $0x248] ss:$0 sm:$0xff] }
 0x2dd   :  { %v1286_v27 = vpack.c.bf16 %v682_v26, %v681_v23  ;;  %v1413_v23 = vmov 0.0|0.0   ;;  %v823_v26 = vld [vmem:[#allocation2 + $0x110] sm:$0xff] }
 0x2de   :  { %1363 = vrcp.f32 %v474_v28  ;;  %v503_v42 = vmul.f32 1.442695, %v500_v36  ;;  %1273 = vmatpush3.bf16.msra.mxu1 %v1270_v15  ;;  %v683_v28 = vld [vmem:[#allocation2 + $0xf0] sm:$0xff]  ;;  %1294 = vmatprep.subr.bf16.mxu0 %v1413_v23 }
 0x2df   :  { %1365 = vpow2.f32 %v501_v37  ;;  %1275 = vmatprep.subr.bf16.mxu1 %v1274_v18 }
 0x2e0   :  { %1367 = vpow2.f32 %v503_v42 }
 0x2e2   :  { %1277 = vmatpush3.bf16.msra.mxu1 %v1274_v18 }
 0x2e3   :  { %1279 = vmatprep.subr.bf16.mxu1 %v1278_v21 }
 0x2e5   :  { %v1362_v30 = vpop.eup %1361 }
 0x2e6   :  { %v479_v33 = vmul.f32 1.0614054, %v1362_v30  ;;  %1281 = vmatpush3.bf16.msra.mxu1 %v1278_v21 }
 0x2e7   :  { %1283 = vmatprep.subr.bf16.mxu1 %v1282_v25 }
 0x2e8   :  { %v481_v34 = vadd.f32 -1.4531521, %v479_v33  ;;  %v1364_v35 = vpop.eup %1363 }
 0x2e9   :  { %v480_v39 = vmul.f32 1.0614054, %v1364_v35  ;;  %v1366_v53 = vpop.eup %1365 }
 0x2ea   :  { %v483_v38 = vmul.f32 %v1362_v30, %v481_v34  ;;  %v1368_v58 = vpop.eup %1367  ;;  %1285 = vmatpush3.bf16.msra.mxu1 %v1282_v25  ;;  %v1295_v25 = vpack.c.bf16 %v822_v24, %v821_v22 }
 0x2eb   :  { %v482_v41 = vadd.f32 -1.4531521, %v480_v39  ;;  %1287 = vmatprep.subr.bf16.mxu1 %v1286_v27 }
 0x2ec   :  { %v485_v40 = vadd.f32 1.4214138, %v483_v38 }
 0x2ed   :  { %v484_v44 = vmul.f32 %v1364_v35, %v482_v41 }
 0x2ee   :  { %v487_v43 = vmul.f32 %v1362_v30, %v485_v40  ;;  %1289 = vmatpush3.bf16.msra.mxu1 %v1286_v27  ;;  %v824_v27 = vld [vmem:[#allocation2 + $0x118] sm:$0xff] }
 0x2ef   :  { %v486_v46 = vadd.f32 1.4214138, %v484_v44 }
 0x2f0   :  { %v489_v45 = vadd.f32 -0.28449672, %v487_v43 }
 0x2f1   :  { %v488_v48 = vmul.f32 %v1364_v35, %v486_v46 }
 0x2f2   :  { %v491_v47 = vmul.f32 %v1362_v30, %v489_v45 }
 0x2f3   :  { %v490_v50 = vadd.f32 -0.28449672, %v488_v48 }
 0x2f4   :  { %v493_v49 = vadd.f32 0.2548296, %v491_v47 }
 0x2f5   :  { %v492_v52 = vmul.f32 %v1364_v35, %v490_v50 }
 0x2f6   :  { %v495_v51 = vmul.f32 %v1362_v30, %v493_v49  ;;  %v1290_v30 = vpack.c.bf16 %v684_v29, %v683_v28  ;;  %v1298_v28 = vpack.c.bf16 %v824_v27, %v823_v26  ;;  %v825_v29 = vld [vmem:[#allocation2 + $0x120] sm:$0xff] }
 0x2f7   :  { %v494_v55 = vadd.f32 0.2548296, %v492_v52 }
 0x2f8   :  { %v505_v54 = vmul.f32 %v1366_v53, %v495_v51  ;;  %1291 = vmatprep.subr.bf16.mxu1 %v1290_v30 }
 0x2f9   :  { %v496_v57 = vmul.f32 %v1364_v35, %v494_v55  ;;  %1293 = vmatpush3.bf16.msra.mxu1 %v1290_v30  ;;  %v826_v30 = vld [vmem:[#allocation2 + $0x128] sm:$0xff] }
 0x2fa   :  { %v507_v56 = vsub.f32 1.0, %v505_v54  ;;  %1318 = vmatprep.subr.bf16.mxu1 %v1413_v23 }
 0x2fb   :  { %v506_v60 = vmul.f32 %v1368_v58, %v496_v57 }
 0x2fc   :  { %v511_v59 = vsub.f32 0.0, %v507_v56 }
 0x2fd   :  { %v508_v62 = vsub.f32 1.0, %v506_v60 }
 0x2fe   :  { %v513_v61 = vsel %vm509_vm1, %v507_v56, %v511_v59 }
 0x2ff   :  { %v515_v0 = vadd.f32 1.0, %v513_v61  ;;  %v512_v1 = vsub.f32 0.0, %v508_v62 }
 0x301   :  { %v517_v2 = vmul.f32 %v515_v0, %v465_v63  ;;  %v514_v3 = vsel %vm510_vm2, %v508_v62, %v512_v1 }
 0x302   :  { %v516_v5 = vadd.f32 1.0, %v514_v3 }
 0x303   :  { %1142 = vmatprep.mubr.f32.mxu0 %v517_v2 }
 0x304   :  { %v518_v6 = vmul.f32 %v516_v5, %v466_v4 }
 0x306   :  { %1143 = vmatmul.mubr.f32.vlgmr.msra.gmra.mrb[0].mxu0 %v518_v6 }
 0x307   :  { %1296 = vmatpush3.bf16.msra.mxu0 %v1295_v25 }
 0x308   :  { %1297 = vmatprep.subr.bf16.mxu0 %v1413_v23 }
 0x30b   :  { %1299 = vmatpush3.bf16.msra.mxu0 %v1298_v28 }
 0x30c   :  { %1300 = vmatprep.subr.bf16.mxu0 %v1413_v23 }
 0x3d9   :  { %v1144_v32 = vpop.f32.mrb[0].mxu0 }
 0x3da   :  { %v612_v33 = vadd.f32 %v1144_v32, %v999_v31  ;;  %v606_v34 = vpop.f32.mrb[1].mxu0  ;;  %v827_v32 = vld [vmem:[#allocation2 + $0x130] sm:$0xff] }
 0x3db   :  { %v607_v35 = vadd.f32 %v999_v31, %v606_v34  ;;  %v1301_v31 = vpack.c.bf16 %v826_v30, %v825_v29 }
 0x3dc   :  { %v618_v36 = vmul.f32 0.70710677, %v612_v33  ;;  %v616_v19 = vmul.f32 0.5, %v612_v33  ;;  %v828_v33 = vld [vmem:[#allocation2 + $0x138] sm:$0xff] }
 0x3dd   :  { %v617_v37 = vmul.f32 0.70710677, %v607_v35  ;;  %v615_v17 = vmul.f32 0.5, %v607_v35  ;;  %1302 = vmatpush3.bf16.msra.mxu0 %v1301_v31  ;;  %v1304_v34 = vpack.c.bf16 %v828_v33, %v827_v32  ;;  %v829_v35 = vld [vmem:[#allocation2 + $0x140] sm:$0xff] }
 0x3de   :  { %v620_v38 = vand.u32 2147483647, %v618_v36  ;;  %vm660_vm3 = vcmp.ge.f32.partialorder %v618_v36, 0.0  ;;  %1303 = vmatprep.subr.bf16.mxu0 %v1413_v23  ;;  %v830_v36 = vld [vmem:[#allocation2 + $0x148] sm:$0xff] }
 0x3df   :  { %v619_v39 = vand.u32 2147483647, %v617_v37  ;;  %vm659_vm4 = vcmp.ge.f32.partialorder %v617_v37, 0.0  ;;  %v1307_v37 = vpack.c.bf16 %v830_v36, %v829_v35 }
 0x3e0   :  { %v622_v40 = vmul.f32 0.3275911, %v620_v38  ;;  %v648_v44 = vsub.f32 0.0, %v620_v38 }
 0x3e1   :  { %v621_v41 = vmul.f32 0.3275911, %v619_v39  ;;  %v647_v45 = vsub.f32 0.0, %v619_v39  ;;  %1305 = vmatpush3.bf16.msra.mxu0 %v1304_v34 }
 0x3e2   :  { %v624_v42 = vadd.f32 1.0, %v622_v40  ;;  %v650_v47 = vmul.f32 %v648_v44, %v620_v38  ;;  %1306 = vmatprep.subr.bf16.mxu0 %v1413_v23  ;;  %v831_v38 = vld [vmem:[#allocation2 + $0x150] sm:$0xff] }
 0x3e3   :  { %v623_v43 = vadd.f32 1.0, %v621_v41  ;;  %v649_v50 = vmul.f32 %v647_v45, %v619_v39  ;;  %v832_v39 = vld [vmem:[#allocation2 + $0x158] sm:$0xff]  ;;  %v833_v41 = vld [vmem:[#allocation2 + $0x160] sm:$0xff]  ;;  %v835_v44 = vld [vmem:[#allocation2 + $0x170] sm:$0xff] }
 0x3e4   :  { %1369 = vrcp.f32 %v624_v42  ;;  %v653_v53 = vmul.f32 1.442695, %v650_v47  ;;  %v1310_v40 = vpack.c.bf16 %v832_v39, %v831_v38  ;;  %v834_v42 = vld [vmem:[#allocation2 + $0x168] sm:$0xff]  ;;  %v836_v45 = vld [vmem:[#allocation2 + $0x178] sm:$0xff]  ;;  %v1415_v47 = vmov 0.0  }
 0x3e5   :  { %1371 = vrcp.f32 %v623_v43  ;;  %v651_v56 = vmul.f32 1.442695, %v649_v50  ;;  %1308 = vmatpush3.bf16.msra.mxu0 %v1307_v37  ;;  %v1313_v43 = vpack.c.bf16 %v834_v42, %v833_v41  ;;  %1212 = vmatprep.mubr.msk.f32.mxu0 %vm1414_vm5, %v1415_v47  ;;  %v819_v41 = vld [vmem:[#allocation2 + $0x24a] sm:$0x1]  ;;  %v1001_v42 = vld [vmem:[#allocation2 + $0x24b] ss:$0 sm:$0xff] }
 0x3e6   :  { %1373 = vpow2.f32 %v653_v53  ;;  %1309 = vmatprep.subr.bf16.mxu0 %v1413_v23 }
 0x3e7   :  { %1375 = vpow2.f32 %v651_v56 }
 0x3e9   :  { %1311 = vmatpush3.bf16.msra.mxu0 %v1310_v40 }
 0x3ea   :  { %1312 = vmatprep.subr.bf16.mxu0 %v1413_v23 }
 0x3ed   :  { %1314 = vmatpush3.bf16.msra.mxu0 %v1313_v43 }
 0x3ee   :  { %v1370_v46 = vpop.eup %1369  ;;  %1315 = vmatprep.subr.bf16.mxu0 %v1413_v23 }
 0x3ef   :  { %v1372_v48 = vpop.eup %1371  ;;  %v630_v49 = vmul.f32 1.0614054, %v1370_v46 }
 0x3f0   :  { %v629_v51 = vmul.f32 1.0614054, %v1372_v48  ;;  %v1374_v5 = vpop.eup %1373 }
 0x3f1   :  { %v632_v52 = vadd.f32 -1.4531521, %v630_v49  ;;  %v1376_v7 = vpop.eup %1375  ;;  %v1000_v49 = vld [vmem:[#allocation2 + $0x249] ss:$0 sm:$0xff] }
 0x3f2   :  { %v631_v54 = vadd.f32 -1.4531521, %v629_v51 }
 0x3f3   :  { %v634_v55 = vmul.f32 %v1370_v46, %v632_v52 }
 0x3f4   :  { %v633_v57 = vmul.f32 %v1372_v48, %v631_v54 }
 0x3f5   :  { %v636_v58 = vadd.f32 1.4214138, %v634_v55 }
 0x3f6   :  { %v635_v59 = vadd.f32 1.4214138, %v633_v57 }
 0x3f7   :  { %v638_v60 = vmul.f32 %v1370_v46, %v636_v58 }
 0x3f8   :  { %v637_v61 = vmul.f32 %v1372_v48, %v635_v59 }
 0x3f9   :  { %v640_v62 = vadd.f32 -0.28449672, %v638_v60 }
 0x3fa   :  { %v639_v63 = vadd.f32 -0.28449672, %v637_v61 }
 0x3fb   :  { %v642_v0 = vmul.f32 %v1370_v46, %v640_v62 }
 0x3fc   :  { %v641_v1 = vmul.f32 %v1372_v48, %v639_v63 }
 0x3fd   :  { %v644_v2 = vadd.f32 0.2548296, %v642_v0 }
 0x3fe   :  { %v643_v3 = vadd.f32 0.2548296, %v641_v1 }
 0x3ff   :  { %v646_v4 = vmul.f32 %v1370_v46, %v644_v2  ;;  %v1316_v46 = vpack.c.bf16 %v836_v45, %v835_v44 }
 0x400   :  { %v645_v6 = vmul.f32 %v1372_v48, %v643_v3  ;;  %v820_v48 = vld [vmem:[%s1506_s1] sm:$0x3] }
 0x401   :  { %v656_v8 = vmul.f32 %v1374_v5, %v646_v4  ;;  %1317 = vmatpush3.bf16.msra.mxu0 %v1316_v46  ;;  %v913_v46 = vld [vmem:[#allocation2 + $0x24c] sm:$0x1] }
 0x402   :  { %v655_v9 = vmul.f32 %v1376_v7, %v645_v6 }
 0x403   :  { %v658_v10 = vsub.f32 1.0, %v656_v8 }
 0x404   :  { %v657_v11 = vsub.f32 1.0, %v655_v9  ;;  %1213 = vmatmul.mubr.f32.vlgmr.msra.gmra.mrb[2].mxu0 %v820_v48 }
 0x405   :  { %v662_v12 = vsub.f32 0.0, %v658_v10 }
 0x406   :  { %v661_v13 = vsub.f32 0.0, %v657_v11 }
 0x407   :  { %v664_v14 = vsel %vm660_vm3, %v658_v10, %v662_v12 }
 0x408   :  { %v666_v15 = vadd.f32 1.0, %v664_v14  ;;  %v663_v16 = vsel %vm659_vm4, %v657_v11, %v661_v13 }
 0x409   :  { %v665_v18 = vadd.f32 1.0, %v663_v16 }
 0x40a   :  { %v668_v21 = vmul.f32 %v666_v15, %v616_v19 }
 0x40b   :  { %v667_v20 = vmul.f32 %v665_v18, %v615_v17 }
 0x40d   :  { %1177 = vmatprep.mubr.f32.mxu1 %v667_v20 }
 0x40e   :  { %1178 = vmatmul.mubr.f32.vlgmr.msra.gmra.mrb[16].mxu1 %v668_v21 }
 0x40f   :  { %1219 = vmatprep.mubr.msk.f32.mxu1 %vm1414_vm5, %v1415_v47 }
 0x4d7   :  { %v908_v43 = vpop.f32.mrb[2].mxu0 }
 0x4d8   :  { %v909_v44 = vadd.f32 %v1001_v42, %v908_v43  ;;  %v1214_v45 = vpop.f32.mrb[3].mxu0 }
 0x4da   :  { %912 = vst [vmem:[%s1508_s3] sm:$0x3] %v909_v44 }
 0x4e1   :  { %v1179_v50 = vpop.f32.mrb[16].mxu1 }
 0x4e2   :  { %v762_v51 = vadd.f32 %v1179_v50, %v1000_v49  ;;  %v756_v52 = vpop.f32.mrb[17].mxu1 }
 0x4e3   :  { %v757_v53 = vadd.f32 %v1000_v49, %v756_v52 }
 0x4e4   :  { %v768_v54 = vmul.f32 0.70710677, %v762_v51  ;;  %v766_v33 = vmul.f32 0.5, %v762_v51 }
 0x4e5   :  { %v767_v55 = vmul.f32 0.70710677, %v757_v53  ;;  %v765_v36 = vmul.f32 0.5, %v757_v53 }
 0x4e6   :  { %v770_v56 = vand.u32 2147483647, %v768_v54  ;;  %vm810_vm6 = vcmp.ge.f32.partialorder %v768_v54, 0.0 }
 0x4e7   :  { %v769_v57 = vand.u32 2147483647, %v767_v55  ;;  %vm809_vm7 = vcmp.ge.f32.partialorder %v767_v55, 0.0 }
 0x4e8   :  { %v772_v58 = vmul.f32 0.3275911, %v770_v56  ;;  %v798_v62 = vsub.f32 0.0, %v770_v56 }
 0x4e9   :  { %v771_v59 = vmul.f32 0.3275911, %v769_v57  ;;  %v797_v63 = vsub.f32 0.0, %v769_v57 }
 0x4ea   :  { %v774_v60 = vadd.f32 1.0, %v772_v58  ;;  %v800_v1 = vmul.f32 %v798_v62, %v770_v56 }
 0x4eb   :  { %v773_v61 = vadd.f32 1.0, %v771_v59  ;;  %v799_v4 = vmul.f32 %v797_v63, %v769_v57 }
 0x4ec   :  { %1377 = vrcp.f32 %v774_v60  ;;  %v803_v7 = vmul.f32 1.442695, %v800_v1 }
 0x4ed   :  { %1379 = vrcp.f32 %v773_v61  ;;  %v801_v10 = vmul.f32 1.442695, %v799_v4 }
 0x4ee   :  { %1381 = vpow2.f32 %v803_v7 }
 0x4ef   :  { %1383 = vpow2.f32 %v801_v10 }
 0x4f6   :  { %v1378_v0 = vpop.eup %1377 }
 0x4f7   :  { %v1380_v2 = vpop.eup %1379  ;;  %v780_v3 = vmul.f32 1.0614054, %v1378_v0 }
 0x4f8   :  { %v779_v5 = vmul.f32 1.0614054, %v1380_v2  ;;  %v1382_v24 = vpop.eup %1381 }
 0x4f9   :  { %v782_v6 = vadd.f32 -1.4531521, %v780_v3  ;;  %v1384_v23 = vpop.eup %1383 }
 0x4fa   :  { %v781_v8 = vadd.f32 -1.4531521, %v779_v5 }
 0x4fb   :  { %v784_v9 = vmul.f32 %v1378_v0, %v782_v6 }
 0x4fc   :  { %v783_v11 = vmul.f32 %v1380_v2, %v781_v8 }
 0x4fd   :  { %v786_v12 = vadd.f32 1.4214138, %v784_v9 }
 0x4fe   :  { %v785_v13 = vadd.f32 1.4214138, %v783_v11 }
 0x4ff   :  { %v788_v14 = vmul.f32 %v1378_v0, %v786_v12 }
 0x500   :  { %v787_v15 = vmul.f32 %v1380_v2, %v785_v13 }
 0x501   :  { %v790_v16 = vadd.f32 -0.28449672, %v788_v14 }
 0x502   :  { %v789_v17 = vadd.f32 -0.28449672, %v787_v15 }
 0x503   :  { %v792_v18 = vmul.f32 %v1378_v0, %v790_v16 }
 0x504   :  { %v791_v19 = vmul.f32 %v1380_v2, %v789_v17 }
 0x505   :  { %v794_v20 = vadd.f32 0.2548296, %v792_v18 }
 0x506   :  { %v793_v21 = vadd.f32 0.2548296, %v791_v19 }
 0x507   :  { %v796_v22 = vmul.f32 %v1378_v0, %v794_v20 }
 0x508   :  { %v795_v25 = vmul.f32 %v1380_v2, %v793_v21 }
 0x509   :  { %v806_v26 = vmul.f32 %v1382_v24, %v796_v22 }
 0x50a   :  { %v805_v27 = vmul.f32 %v1384_v23, %v795_v25 }
 0x50b   :  { %v808_v28 = vsub.f32 1.0, %v806_v26 }
 0x50c   :  { %v807_v29 = vsub.f32 1.0, %v805_v27 }
 0x50d   :  { %v812_v30 = vsub.f32 0.0, %v808_v28 }
 0x50e   :  { %v811_v31 = vsub.f32 0.0, %v807_v29 }
 0x50f   :  { %v814_v32 = vsel %vm810_vm6, %v808_v28, %v812_v30 }
 0x510   :  { %v816_v34 = vadd.f32 1.0, %v814_v32  ;;  %v813_v35 = vsel %vm809_vm7, %v807_v29, %v811_v31 }
 0x511   :  { %v815_v37 = vadd.f32 1.0, %v813_v35 }
 0x512   :  { %v818_v38 = vmul.f32 %v816_v34, %v766_v33 }
 0x513   :  { %v817_v39 = vmul.f32 %v815_v37, %v765_v36 }
 0x515   :  { %v1319_v40 = vpack.c.bf16 %v818_v38, %v817_v39 }
 0x517   :  { %1320 = vmatpush3.bf16.xpose.msra.mxu1 %v1319_v40 }
 0x51e   :  { %1220 = vmatmul.mubr.f32.vlgmr.msra.gmra.mrb[18].mxu1 %v819_v41 }
 0x5f1   :  { %v980_v47 = vpop.f32.mrb[18].mxu1 }
 0x5f2   :  { %v981_v48 = vadd.f32 %v980_v47, %v913_v46  ;;  %v1221_v49 = vpop.f32.mrb[19].mxu1 }
 0x5f4   :  { %985 = vst.msk [vmem:[%s1508_s3 + $0x2] sm:$0x1] %vm984_vm8, %v981_v48 }
 0x5f5   :  { %990 = vsyncpa [#allocation3], 1 }

</bundles_post_ra>
